<compile_context>
chip_gen: v7x
topology: tpu7x:2x2x1
jax: 0.10.0
libtpu: 0.0.40
codegen_flags: <defaults>
</compile_context>

<pallas_src>
import jax
import jax.numpy as jnp
from jax.experimental import pallas as pl
from jax.experimental.pallas import tpu as pltpu


def mlp_kernel(x_ref, w_in_t_ref, b_in_ref, w_mid_t_ref, b_mid_ref,
               w_out_ref, b_out_ref, o_ref):
    # x_ref:       (D_in, TB)   batch on lanes
    # w_in_t_ref:  (H, D_in)
    # b_in_ref:    (H, 1)
    # w_mid_t_ref: (L, H, H)    pre-transposed: w_mid_t[l] = W_mid[l].T
    # b_mid_ref:   (L, H, 1)
    # w_out_ref:   (H, 1)
    # b_out_ref:   (1,)         scalar in SMEM
    # o_ref:       (1, TB)      lane-dense output tile
    if x_ref.shape[0] == 1:
        # Input layer with K = D_in = 1: outer-product broadcast FMA on the
        # VPU instead of a degenerate 1-wide MXU pass.
        h = w_in_t_ref[...] * x_ref[...] + b_in_ref[...]          # (H, TB)
    else:
        h = jnp.dot(w_in_t_ref[...], x_ref[...],
                    preferred_element_type=jnp.float32) + b_in_ref[...]

    num_layers = w_mid_t_ref.shape[0]   # static; small L -> static unroll is fine
    for l in range(num_layers):
        h = jnp.tanh(jnp.dot(w_mid_t_ref[l], h,
                             preferred_element_type=jnp.float32)
                     + b_mid_ref[l])

    # Output layer with N_out = 1: sublane reduction instead of a 1-lane-wide
    # MXU result tile; result is already lane-dense (1, TB).
    o_ref[...] = (jnp.sum(w_out_ref[...] * h, axis=0, keepdims=True)
                  + b_out_ref[0])


def mlp_forward(x2d, w_in, b_in, w_mid, b_mid, w_out, b_out, *, tile_b=None):
    """x2d: (N, D_in) f32; weights in PyTorch-Linear math layout (in, out).
    Returns (N,) f32 — matches NeuralNetworkFunction.forward."""
    N, D_in = x2d.shape
    H = w_in.shape[1]
    L = w_mid.shape[0]

    # Lane-dense batch tile: multiple of 128, big enough to amortize per-step
    # overhead, but keep >= 2 grid steps when possible (v7x megacore).
    if tile_b is None:
        half = (N // 2 // 128) * 128
        tile_b = int(min(2048, max(128, half)))
    assert tile_b % 128 == 0

    G = pl.cdiv(N, tile_b)
    N_pad = G * tile_b

    # ---- layout plumbing (wrapper-side only, no compute hoisting) ----
    x_t = jnp.transpose(x2d)                              # (D_in, N), batch on lanes
    if N_pad != N:
        x_t = jnp.pad(x_t, ((0, 0), (0, N_pad - N)))      # masked tail handled by pad+slice
    w_in_t = jnp.transpose(w_in)                          # (H, D_in)
    b_in_c = b_in.reshape(H, 1)
    w_mid_t = jnp.transpose(w_mid, (0, 2, 1))             # (L, H, H)
    b_mid_c = b_mid.reshape(L, H, 1)
    w_out_c = w_out.reshape(H, 1)
    b_out_s = b_out.reshape(1)

    out = pl.pallas_call(
        mlp_kernel,
        out_shape=jax.ShapeDtypeStruct((1, N_pad), jnp.float32),
        grid_spec=pltpu.PrefetchScalarGridSpec(
            num_scalar_prefetch=0,
            grid=(G,),
            in_specs=[
                pl.BlockSpec((D_in, tile_b), lambda i: (0, i)),     # x (lanes = batch)
                pl.BlockSpec((H, D_in), lambda i: (0, 0)),          # W_in^T
                pl.BlockSpec((H, 1), lambda i: (0, 0)),             # b_in (column)
                pl.BlockSpec((L, H, H), lambda i: (0, 0, 0)),       # W_mid^T stack
                pl.BlockSpec((L, H, 1), lambda i: (0, 0, 0)),       # b_mid (columns)
                pl.BlockSpec((H, 1), lambda i: (0, 0)),             # w_out (column)
                pl.BlockSpec(memory_space=pltpu.MemorySpace.SMEM),  # b_out scalar
            ],
            out_specs=pl.BlockSpec((1, tile_b), lambda i: (0, i)),  # lane-dense
        ),
        compiler_params=pltpu.CompilerParams(
            dimension_semantics=("parallel",)),
        cost_estimate=pl.CostEstimate(
            flops=2 * N_pad * (D_in * H + L * H * H + H),
            transcendentals=N_pad * H * L,
            bytes_accessed=4 * (D_in * N_pad + N_pad + D_in * H + H
                                + L * H * H + L * H + H + 1),
        ),
    )(x_t, w_in_t, b_in_c, w_mid_t, b_mid_c, w_out_c, b_out_s)

    return out[0, :N]


def init_params(key, input_dim, num_hidden, num_layers):
    """Deterministic PyTorch-Linear-style uniform init; W stored as (in, out)."""
    ks = jax.random.split(key, 2 * num_layers + 4)

    def lin(kw, kb, fan_in, fan_out):
        bound = 1.0 / jnp.sqrt(jnp.float32(fan_in))
        w = jax.random.uniform(kw, (fan_in, fan_out), jnp.float32, -bound, bound)
        b = jax.random.uniform(kb, (fan_out,), jnp.float32, -bound, bound)
        return w, b

    w_in, b_in = lin(ks[0], ks[1], input_dim, num_hidden)
    w_mids, b_mids = [], []
    for l in range(num_layers):
        wm, bm = lin(ks[2 + 2 * l], ks[3 + 2 * l], num_hidden, num_hidden)
        w_mids.append(wm)
        b_mids.append(bm)
    w_out, b_out = lin(ks[2 + 2 * num_layers], ks[3 + 2 * num_layers],
                       num_hidden, 1)
    return (w_in, b_in, jnp.stack(w_mids, 0), jnp.stack(b_mids, 0),
            w_out, b_out)


def reference_forward(x2d, w_in, b_in, w_mid, b_mid, w_out, b_out):
    h = x2d @ w_in + b_in[None, :]
    for l in range(w_mid.shape[0]):
        h = jnp.tanh(h @ w_mid[l] + b_mid[l][None, :])
    out = h @ w_out + b_out[None, :]
    return out[:, 0]


if __name__ == "__main__":
    input_dim = 1      # module default: forward(x) stacks a single input on dim 1
    num_hidden = 32
    num_layers = 2
    N = 1024           # batch size -> tile_b=512, grid of 2 (both v7x TCs busy)

    key = jax.random.PRNGKey(0)
    k_x, k_p = jax.random.split(key)

    # forward(x): torch.stack((x,), dim=1) -> (N, input_dim)
    x = jax.random.normal(k_x, (N,), jnp.float32)
    x2d = jnp.stack([x], axis=1)

    params = init_params(k_p, input_dim, num_hidden, num_layers)

    y = mlp_forward(x2d, *params)
    y = jax.block_until_ready(y)

    y_ref = reference_forward(x2d, *params)
    assert y.shape == (N,)
    assert jnp.allclose(y, y_ref, atol=1e-4, rtol=1e-4)

    print("KERNEL_OK")
</pallas_src>

<mosaic_0001>
module attributes {stable_mosaic.version = 11 : i64} {
  func.func @mlp_kernel(%arg0: i32, %arg1: memref<1x512xf32, #tpu.memory_space<vmem>>, %arg2: memref<32x1xf32, #tpu.memory_space<vmem>>, %arg3: memref<32x1xf32, #tpu.memory_space<vmem>>, %arg4: memref<2x32x32xf32, #tpu.memory_space<vmem>>, %arg5: memref<2x32x1xf32, #tpu.memory_space<vmem>>, %arg6: memref<32x1xf32, #tpu.memory_space<vmem>>, %arg7: memref<1xf32, #tpu.memory_space<smem>>, %arg8: memref<1x512xf32, #tpu.memory_space<vmem>>) attributes {dimension_semantics = [#tpu.dimension_semantics<parallel>], iteration_bounds = array<i64: 2>, scalar_prefetch = 0 : i64, scratch_operands = 0 : i64, tpu.core_type = #tpu.core_type<tc>, window_params = [{transform_indices = @transform_0, window_bounds = array<i64: 1, 512>}, {pipeline_mode = #tpu.pipeline_mode<synchronous>, transform_indices = @transform_1, window_bounds = array<i64: 32, 1>}, {pipeline_mode = #tpu.pipeline_mode<synchronous>, transform_indices = @transform_2, window_bounds = array<i64: 32, 1>}, {pipeline_mode = #tpu.pipeline_mode<synchronous>, transform_indices = @transform_3, window_bounds = array<i64: 2, 32, 32>}, {pipeline_mode = #tpu.pipeline_mode<synchronous>, transform_indices = @transform_4, window_bounds = array<i64: 2, 32, 1>}, {pipeline_mode = #tpu.pipeline_mode<synchronous>, transform_indices = @transform_5, window_bounds = array<i64: 32, 1>}, {transform_indices = @transform_6, window_bounds = array<i64: 1>}, {transform_indices = @transform_7, window_bounds = array<i64: 1, 512>}]} {
    %c0 = arith.constant 0 : index
    %c0_0 = arith.constant 0 : index
    %0 = vector.load %arg2[%c0, %c0_0] : memref<32x1xf32, #tpu.memory_space<vmem>>, vector<32x1xf32>
    %c0_1 = arith.constant 0 : index
    %c0_2 = arith.constant 0 : index
    %1 = vector.load %arg1[%c0_1, %c0_2] : memref<1x512xf32, #tpu.memory_space<vmem>>, vector<1x512xf32>
    %2 = vector.broadcast %0 : vector<32x1xf32> to vector<32x512xf32>
    %3 = vector.broadcast %1 : vector<1x512xf32> to vector<32x512xf32>
    %4 = arith.mulf %2, %3 : vector<32x512xf32>
    %c0_3 = arith.constant 0 : index
    %c0_4 = arith.constant 0 : index
    %5 = vector.load %arg3[%c0_3, %c0_4] : memref<32x1xf32, #tpu.memory_space<vmem>>, vector<32x1xf32>
    %6 = vector.broadcast %5 : vector<32x1xf32> to vector<32x512xf32>
    %7 = arith.addf %4, %6 : vector<32x512xf32>
    %c0_5 = arith.constant 0 : index
    %c0_6 = arith.constant 0 : index
    %c0_7 = arith.constant 0 : index
    %8 = vector.load %arg4[%c0_5, %c0_6, %c0_7] : memref<2x32x32xf32, #tpu.memory_space<vmem>>, vector<1x32x32xf32>
    %9 = vector.shape_cast %8 : vector<1x32x32xf32> to vector<32x32xf32>
    %cst = arith.constant dense<0.000000e+00> : vector<32x512xf32>
    %10 = tpu.matmul %9, %7, %cst {dimension_numbers = #tpu.dot_dimension_numbers<[1], [0], [0], [1], [0, 0, 1, 1], [], []>} : vector<32x32xf32>, vector<32x512xf32>, vector<32x512xf32> -> vector<32x512xf32>
    %c0_8 = arith.constant 0 : index
    %c0_9 = arith.constant 0 : index
    %c0_10 = arith.constant 0 : index
    %11 = vector.load %arg5[%c0_8, %c0_9, %c0_10] : memref<2x32x1xf32, #tpu.memory_space<vmem>>, vector<1x32x1xf32>
    %12 = vector.shape_cast %11 : vector<1x32x1xf32> to vector<32x1xf32>
    %13 = vector.broadcast %12 : vector<32x1xf32> to vector<32x512xf32>
    %14 = arith.addf %10, %13 : vector<32x512xf32>
    %15 = math.tanh %14 : vector<32x512xf32>
    %c1 = arith.constant 1 : index
    %c0_11 = arith.constant 0 : index
    %c0_12 = arith.constant 0 : index
    %16 = vector.load %arg4[%c1, %c0_11, %c0_12] : memref<2x32x32xf32, #tpu.memory_space<vmem>>, vector<1x32x32xf32>
    %17 = vector.shape_cast %16 : vector<1x32x32xf32> to vector<32x32xf32>
    %cst_13 = arith.constant dense<0.000000e+00> : vector<32x512xf32>
    %18 = tpu.matmul %17, %15, %cst_13 {dimension_numbers = #tpu.dot_dimension_numbers<[1], [0], [0], [1], [0, 0, 1, 1], [], []>} : vector<32x32xf32>, vector<32x512xf32>, vector<32x512xf32> -> vector<32x512xf32>
    %c1_14 = arith.constant 1 : index
    %c0_15 = arith.constant 0 : index
    %c0_16 = arith.constant 0 : index
    %19 = vector.load %arg5[%c1_14, %c0_15, %c0_16] : memref<2x32x1xf32, #tpu.memory_space<vmem>>, vector<1x32x1xf32>
    %20 = vector.shape_cast %19 : vector<1x32x1xf32> to vector<32x1xf32>
    %21 = vector.broadcast %20 : vector<32x1xf32> to vector<32x512xf32>
    %22 = arith.addf %18, %21 : vector<32x512xf32>
    %23 = math.tanh %22 : vector<32x512xf32>
    %c0_17 = arith.constant 0 : index
    %c0_18 = arith.constant 0 : index
    %24 = vector.load %arg6[%c0_17, %c0_18] : memref<32x1xf32, #tpu.memory_space<vmem>>, vector<32x1xf32>
    %25 = vector.broadcast %24 : vector<32x1xf32> to vector<32x512xf32>
    %26 = arith.mulf %25, %23 : vector<32x512xf32>
    %cst_19 = arith.constant dense<0.000000e+00> : vector<512xf32>
    %27 = vector.multi_reduction <add>, %26, %cst_19 [0] : vector<32x512xf32> to vector<512xf32>
    %28 = vector.shape_cast %27 : vector<512xf32> to vector<1x512xf32>
    %c0_20 = arith.constant 0 : index
    %29 = memref.load %arg7[%c0_20] : memref<1xf32, #tpu.memory_space<smem>>
    %30 = vector.broadcast %29 : f32 to vector<1x512xf32>
    %31 = arith.addf %28, %30 : vector<1x512xf32>
    %c0_21 = arith.constant 0 : index
    %c0_22 = arith.constant 0 : index
    %32 = vector.load %arg8[%c0_21, %c0_22] : memref<1x512xf32, #tpu.memory_space<vmem>>, vector<1x512xf32>
    tpu.vector_store %arg8[%c0_21, %c0_22], %31 {strides = array<i32>} : memref<1x512xf32, #tpu.memory_space<vmem>>, vector<1x512xf32>,
    return
  }
  func.func @transform_0(%arg0: i32) -> (i32, i32) {
    %c0_i32 = arith.constant 0 : i32
    %c0_i32_0 = arith.constant 0 : i32
    return %c0_i32, %arg0 : i32, i32
  }
  func.func @transform_1(%arg0: i32) -> (i32, i32) {
    %c0_i32 = arith.constant 0 : i32
    %c0_i32_0 = arith.constant 0 : i32
    %c0_i32_1 = arith.constant 0 : i32
    return %c0_i32, %c0_i32_0 : i32, i32
  }
  func.func @transform_2(%arg0: i32) -> (i32, i32) {
    %c0_i32 = arith.constant 0 : i32
    %c0_i32_0 = arith.constant 0 : i32
    %c0_i32_1 = arith.constant 0 : i32
    return %c0_i32, %c0_i32_0 : i32, i32
  }
  func.func @transform_3(%arg0: i32) -> (i32, i32, i32) {
    %c0_i32 = arith.constant 0 : i32
    %c0_i32_0 = arith.constant 0 : i32
    %c0_i32_1 = arith.constant 0 : i32
    %c0_i32_2 = arith.constant 0 : i32
    return %c0_i32, %c0_i32_0, %c0_i32_1 : i32, i32, i32
  }
  func.func @transform_4(%arg0: i32) -> (i32, i32, i32) {
    %c0_i32 = arith.constant 0 : i32
    %c0_i32_0 = arith.constant 0 : i32
    %c0_i32_1 = arith.constant 0 : i32
    %c0_i32_2 = arith.constant 0 : i32
    return %c0_i32, %c0_i32_0, %c0_i32_1 : i32, i32, i32
  }
  func.func @transform_5(%arg0: i32) -> (i32, i32) {
    %c0_i32 = arith.constant 0 : i32
    %c0_i32_0 = arith.constant 0 : i32
    %c0_i32_1 = arith.constant 0 : i32
    return %c0_i32, %c0_i32_0 : i32, i32
  }
  func.func @transform_6(%arg0: i32) -> i32 {
    %c0_i32 = arith.constant 0 : i32
    %c0_i32_0 = arith.constant 0 : i32
    return %c0_i32 : i32
  }
  func.func @transform_7(%arg0: i32) -> (i32, i32) {
    %c0_i32 = arith.constant 0 : i32
    %c0_i32_0 = arith.constant 0 : i32
    return %c0_i32, %arg0 : i32, i32
  }
}

</mosaic_0001>

<bundles_post_ra>
// kernel: tpu_custom_call.1
= control target key start
LH: loop header
LB: loop body
LE: loop exit
PB: predicated region body
PF: predicated region fallthrough
CT: control target
= control target key end

     0   :  { %s1549_s0 = inlined_call_operand.vmem [shape: f32[1,1024], index: 0, kind: input, shape index: {}]   ;;  %s1550_s1 = inlined_call_operand.vmem [shape: f32[32,1], index: 1, kind: input, shape index: {}]   ;;  %s1551_s2 = inlined_call_operand.vmem [shape: f32[32,1], index: 2, kind: input, shape index: {}]   ;;  %s1552_s3 = inlined_call_operand.vmem [shape: f32[2,32,32], index: 3, kind: input, shape index: {}]   ;;  %s1553_s4 = inlined_call_operand.vmem [shape: f32[2,32,1], index: 4, kind: input, shape index: {}]   ;;  %s1554_s5 = inlined_call_operand.vmem [shape: f32[32,1], index: 5, kind: input, shape index: {}]   ;;  %s1555_s6 = inlined_call_operand.<no memory space> [shape: f32[1], index: 6, kind: input, shape index: {}]   ;;  %s1556_s7 = inlined_call_operand.hbm [shape: f32[1,1024], index: 7, kind: output, shape index: {}]  }
   0x1   :  { %12 = sst [smem:[#allocation2]] %s1555_s6 }
   0x2   :  { %13 = vsyncpa [#allocation4], 0 }
   0x3   :  { %15 = vsyncpa [#allocation4 + $0x1], 0  ;;  %s1325_s26 = smov 0   ;;  %s1327_s27 = smov 0  }
   0x4   :  { %s1329_s28 = smov 0   ;;  %s1331_s29 = smov 0  }
   0x5 LB: > { %s1346_s6 = sadd.s32 4294967295, %s1276_s29   ;;  %s1038_s30 = sadd.s32 4294967294, %s1276_s29   ;;  %s1276_s29 = sphi %s1331_s29, %s1562_s29   ;;  %s1272_s28 = sphi %s1329_s28, %s1561_s28   ;;  %s1268_s27 = sphi %s1327_s27, %s1560_s27   ;;  %s1264_s26 = sphi %s1325_s26, %s1559_s26  }
   0x6   : > { %s1350_s8 = sadd.s32 1, %s1276_s29   ;;  %s180_s9 = sadd.s32 1, %s1272_s28 }
   0x7   : > { %s177_s10 = ssub.s32 %s1276_s29, %s1350_s8  ;;  %p190_p0 = scmp.ne.s32.totalorder %s1272_s28, %s1268_s27 }
   0x8   : > { %p178_p1 = scmp.eq.s32.totalorder %s177_s10, 0  ;;  %p191_p2 = scmp.eq.s32.totalorder %s1346_s6, 1 }
   0x9   : > { %p196_p3 = scmp.ne.s32.totalorder %s1268_s27, %s1264_s26  ;;  %p197_p4 = scmp.eq.s32.totalorder %s1038_s30, 1 }
   0xa   : > { %s1361_s11 = scalar_select %p178_p1, %s1272_s28, %s180_s9  }
   0xb   : > { %p1363_p5 = por %p191_p2, %p190_p0  ;;  %p1367_p6 = por %p197_p4, %p196_p3 }
   0xc   : > { %p1041_p7 = scmp.ge.s32.totalorder %s1276_s29, 1  ;;  %p241_p8 = scmp.lt.s32.totalorder %s1276_s29, 3 }
   0xe   : > { %p242_p9 = pnand %p1041_p7, %p241_p8 }
   0xf   : > { %v340_v0 = vld [vmem:[%s1551_s2] sm:$0xff] (!%p242_p9)  ;;  %v1278_v2 = vmov (!%p242_p9), 0   ;;  %v341_v3 = vld [vmem:[%s1551_s2 + $0x8] sm:$0xff] (!%p242_p9)  ;;  %v281_v5 = vld [vmem:[%s1550_s1 + $0x18] sm:$0xff] (!%p242_p9)  ;;  %v1279_v15 = vmov (!%p242_p9), 0.0   ;;  %s1043_s24 = sshll.u32 (!%p242_p9), %s1346_s6, 2  ;;  %v304_v22 = vlaneseq (!%p242_p9) }
  0x10   : > { %245 = sbr.rel (%p242_p9) target bundleno = 691 (0x2b3), region = 48  ;;  %v278_v1 = vld [vmem:[%s1550_s1] sm:$0xff] (!%p242_p9)  ;;  %1149 = vset.pattern.permute.xlu1 (!%p242_p9), %v1278_v2  ;;  %1148 = vset.pattern.permute.xlu0 (!%p242_p9), %v1278_v2  ;;  %v279_v4 = vld [vmem:[%s1550_s1 + $0x8] sm:$0xff] (!%p242_p9)  ;;  %v280_v6 = vld [vmem:[%s1550_s1 + $0x10] sm:$0xff] (!%p242_p9)  ;;  %p273_p10 = scmp.lt.s32.totalorder (!%p242_p9), %s1043_s24, 7  ;;  %vm408_vm0 = vcmask (!%p242_p9), 261120  }
  0x11   : > { %346 = vperm.xlu1 (!%p242_p9), %1149, %v340_v0   ;;  %285 = vperm.xlu0 (!%p242_p9), %1148, %v278_v1   ;;  %v343_v7 = vld [vmem:[%s1551_s2 + $0x18] sm:$0xff] (!%p242_p9)  ;;  %v342_v8 = vld [vmem:[%s1551_s2 + $0x10] sm:$0xff] (!%p242_p9)  ;;  %v385_v9 = vld [vmem:[%s1553_s4 + $0x8] sm:$0xff] (!%p242_p9)  ;;  %v1437_v23 = vshrl.u32 (!%p242_p9), %v304_v22, 7  ;;  %s927_s14 = sld [smem:[#allocation2]] (!%p242_p9)  ;;  %s269_s15 = sand.u32 (!%p242_p9), 1, %s1268_s27  }
  0x12   : > { %v384_v10 = vld [vmem:[%s1553_s4] sm:$0xff] (!%p242_p9)  ;;  %v387_v11 = vld [vmem:[%s1553_s4 + $0x18] sm:$0xff] (!%p242_p9)  ;;  %v386_v12 = vld [vmem:[%s1553_s4 + $0x10] sm:$0xff] (!%p242_p9)  ;;  %485 = vmatprep.mubr.f32.mxu0 (!%p242_p9), %v1279_v15  ;;  %574 = vmatprep.mubr.f32.mxu1 (!%p242_p9), %v1279_v15  ;;  %s1042_s16 = sshll.u32 (!%p242_p9), %s269_s15, 2  ;;  %s1073_s17 = sshll.u32 (!%p242_p9), %s1346_s6, 6  ;;  %vm964_vm1 = vcmp.lt.s32.totalorder (!%p242_p9), %v304_v22, 512 }
  0x13   : > { %v1057_v13 = vld [vmem:[%s1553_s4 + $0x28] sm:$0xff] (!%p242_p9)  ;;  %v1056_v14 = vld [vmem:[%s1553_s4 + $0x20] sm:$0xff] (!%p242_p9)  ;;  %v1059_v16 = vld [vmem:[%s1553_s4 + $0x38] sm:$0xff] (!%p242_p9)  ;;  %v306_v24 = vsub.s32 (!%p242_p9), 0, %v1437_v23  ;;  %v310_v25 = vsub.s32 (!%p242_p9), 1, %v1437_v23  ;;  %v314_v26 = vsub.s32 (!%p242_p9), 2, %v1437_v23  ;;  %s1507_s22 = scalar_lea.hbm (!%p242_p9), %s1556_s7, %s1073_s17 }
  0x14   : > { %v1058_v17 = vld [vmem:[%s1553_s4 + $0x30] sm:$0xff] (!%p242_p9)  ;;  %v852_v18 = vld [vmem:[%s1554_s5 + $0x8] sm:$0xff] (!%p242_p9)  ;;  %v851_v19 = vld [vmem:[%s1554_s5] sm:$0xff] (!%p242_p9)  ;;  %v318_v27 = vsub.s32 (!%p242_p9), 3, %v1437_v23  ;;  %s271_s18 = scalar_lea.vmem (!%p242_p9), [#allocation3], %s1042_s16  ;;  %s968_s23 = scalar_lea.sflag (!%p242_p9), [#allocation4], %s269_s15 }
  0x15   : > { %351 = vperm.xlu1 (!%p242_p9), %1149, %v341_v3   ;;  %290 = vperm.xlu0 (!%p242_p9), %1148, %v279_v4   ;;  %v854_v20 = vld [vmem:[%s1554_s5 + $0x18] sm:$0xff] (!%p242_p9)  ;;  %v853_v21 = vld [vmem:[%s1554_s5 + $0x10] sm:$0xff] (!%p242_p9)  ;;  %s982_s19 = sshll.u32 (!%p242_p9), %s271_s18, 4  ;;  %s1281_s6 = smov (!%p242_p9), [#allocation3]   ;;  %s1509_s19 = int_to_ptr.vmem [resolvable:$true] %s982_s19 }
  0x16   : > { %s1218_s25 = sshll.u32 (!%p242_p9), %s1281_s6, 4  ;;  %s1219_s25 = int_to_ptr.vmem [resolvable:$false] %s1218_s25 }
  0x17   : > { %s1564_s24 = smov (!%p273_p10, %s1043_s24), 7  ;;  %s1220_s30 = scalar_lea.vmem %s1219_s25, 128 }
  0x18   : > { %s275_s9 = scalar_lea.vmem %s1549_s0, %s1564_s24  ;;  %s1214_s24 = scalar_lea.vmem %s1509_s19, 64 }
  0x19   : > { %300 = vperm.xlu1 %1149, %v281_v5   ;;  %295 = vperm.xlu0 %1148, %v280_v6   ;;  %v282_v28 = vld [vmem:[%s275_s9] sm:$0xf]  ;;  %p1215_p11 = scmp.ne.s32.totalorder %s1509_s19, %s1214_s24  ;;  %p1221_p0 = scmp.lt.s32.totalorder %s1509_s19, %s1219_s25 }
  0x1a   : > { %v307_v31 = vrot.slane %v282_v28, %v306_v24  ;;  %v311_v32 = vrot.slane %v282_v28, %v310_v25  ;;  %v315_v33 = vrot.slane %v282_v28, %v314_v26  ;;  %v319_v34 = vrot.slane %v282_v28, %v318_v27  ;;  %p1222_p1 = scmp.lt.s32.totalorder %s1220_s30, %s1214_s24 }
  0x1b   : > { %p1216_p12 = pnand %p1215_p11, %p1363_p5 }
  0x1c   : > { %p1223_p2 = por %p1222_p1, %p1221_p0 }
  0x1d   : > { %361 = vperm.xlu1 %1149, %v343_v7   ;;  %356 = vperm.xlu0 %1148, %v342_v8   ;;  %p1217_p13 = pneg %p1216_p12 }
  0x1f   : > { %p1224_p3 = pnand %p1223_p2, %p1217_p13 }
  0x21   : > { %395 = vperm.xlu1 %1149, %v385_v9   ;;  %390 = vperm.xlu0 %1148, %v384_v10  }
  0x25   : > { %405 = vperm.xlu1 %1149, %v387_v11   ;;  %400 = vperm.xlu0 %1148, %v386_v12  }
  0x29   : > { %632 = vperm.xlu1 %1149, %v1057_v13   ;;  %627 = vperm.xlu0 %1148, %v1056_v14  }
  0x2d   : > { %642 = vperm.xlu1 %1149, %v1059_v16   ;;  %637 = vperm.xlu0 %1148, %v1058_v17  }
  0x31   : > { %862 = vperm.xlu1 %1149, %v852_v18   ;;  %857 = vperm.xlu0 %1148, %v851_v19   ;;  %v380_v18 = vld [vmem:[%s1552_s3] sm:$0xff]  ;;  %v381_v19 = vld [vmem:[%s1552_s3 + $0x8] sm:$0xff] }
  0x35   : > { %872 = vperm.xlu1 %1149, %v854_v20   ;;  %867 = vperm.xlu0 %1148, %v853_v21   ;;  %v382_v20 = vld [vmem:[%s1552_s3 + $0x10] sm:$0xff]  ;;  %v383_v21 = vld [vmem:[%s1552_s3 + $0x18] sm:$0xff] }
  0x90   : > { %v347_v29 = vpop.permute.xlu1 %346  ;;  %v286_v30 = vpop.permute.xlu0 %285 }
  0x91   : > { %v325_v37 = vmul.f32 %v311_v32, %v286_v30  ;;  %v327_v38 = vmul.f32 %v319_v34, %v286_v30  ;;  %v324_v39 = vmul.f32 %v307_v31, %v286_v30  ;;  %v326_v40 = vmul.f32 %v315_v33, %v286_v30 }
  0x93   : > { %v365_v51 = vadd.f32 %v347_v29, %v325_v37  ;;  %v367_v52 = vadd.f32 %v347_v29, %v327_v38  ;;  %v364_v53 = vadd.f32 %v347_v29, %v324_v39  ;;  %v366_v54 = vadd.f32 %v347_v29, %v326_v40 }
  0x94   : > { %v352_v35 = vpop.permute.xlu1 %351  ;;  %v291_v36 = vpop.permute.xlu0 %290 }
  0x95   : > { %v329_v41 = vmul.f32 %v311_v32, %v291_v36  ;;  %v331_v42 = vmul.f32 %v319_v34, %v291_v36  ;;  %v328_v43 = vmul.f32 %v307_v31, %v291_v36  ;;  %v330_v44 = vmul.f32 %v315_v33, %v291_v36 }
  0x97   : > { %v369_v45 = vadd.f32 %v352_v35, %v329_v41  ;;  %v371_v46 = vadd.f32 %v352_v35, %v331_v42  ;;  %v368_v47 = vadd.f32 %v352_v35, %v328_v43  ;;  %v370_v48 = vadd.f32 %v352_v35, %v330_v44 }
  0x98   : > { %v301_v49 = vpop.permute.xlu1 %300  ;;  %v296_v50 = vpop.permute.xlu0 %295 }
  0x99   : > { %v336_v55 = vmul.f32 %v307_v31, %v301_v49  ;;  %v337_v56 = vmul.f32 %v311_v32, %v301_v49  ;;  %v338_v57 = vmul.f32 %v315_v33, %v301_v49  ;;  %v339_v58 = vmul.f32 %v319_v34, %v301_v49 }
  0x9a   : > { %v1074_v59 = vpack.c.bf16 %v369_v45, %v365_v51  ;;  %v1082_v60 = vpack.c.bf16 %v371_v46, %v367_v52  ;;  %v1076_v61 = vpack.c.bf16 %v368_v47, %v364_v53  ;;  %v1084_v62 = vpack.c.bf16 %v370_v48, %v366_v54 }
  0x9b   : > { %v332_v63 = vmul.f32 %v307_v31, %v296_v50  ;;  %v333_v0 = vmul.f32 %v311_v32, %v296_v50  ;;  %v334_v1 = vmul.f32 %v315_v33, %v296_v50  ;;  %v335_v2 = vmul.f32 %v319_v34, %v296_v50 }
  0x9c   : > { %v362_v3 = vpop.permute.xlu1 %361  ;;  %v357_v4 = vpop.permute.xlu0 %356  ;;  %1075 = vmatprep.subr.bf16.mxu0 %v1074_v59  ;;  %1083 = vmatprep.subr.bf16.mxu1 %v1082_v60 }
  0x9d   : > { %v376_v5 = vadd.f32 %v362_v3, %v336_v55  ;;  %v377_v6 = vadd.f32 %v362_v3, %v337_v56  ;;  %v378_v7 = vadd.f32 %v362_v3, %v338_v57  ;;  %v379_v8 = vadd.f32 %v362_v3, %v339_v58  ;;  %1077 = vmatpush1.bf16.msra.mxu0 %v1076_v61 }
  0x9e   : > { %v372_v9 = vadd.f32 %v357_v4, %v332_v63  ;;  %v373_v10 = vadd.f32 %v357_v4, %v333_v0  ;;  %v374_v11 = vadd.f32 %v357_v4, %v334_v1  ;;  %v375_v12 = vadd.f32 %v357_v4, %v335_v2  ;;  %1085 = vmatpush1.bf16.msra.mxu1 %v1084_v62 }
  0xa0   : > { %v1078_v13 = vpack.c.bf16 %v377_v6, %v373_v10  ;;  %v1080_v14 = vpack.c.bf16 %v376_v5, %v372_v9  ;;  %v1088_v16 = vpack.c.bf16 %v378_v7, %v374_v11  ;;  %v1086_v17 = vpack.c.bf16 %v379_v8, %v375_v12  ;;  %v391_v24 = vpop.permute.xlu0 %390  ;;  %v396_v33 = vpop.permute.xlu1 %395 }
  0xa2   : > { %1079 = vmatprep.subr.bf16.mxu0 %v1078_v13  ;;  %1087 = vmatprep.subr.bf16.mxu1 %v1086_v17 }
  0xa3   : > { %1081 = vmatpush1.bf16.msra.mxu0 %v1080_v14  ;;  %1089 = vmatpush1.bf16.msra.mxu1 %v1088_v16 }
  0xa4   : > { %v401_v42 = vpop.permute.xlu0 %400  ;;  %v406_v51 = vpop.permute.xlu1 %405 }
  0xa6   : > { %1044 = vmatmul.mubr.msk.f32.vlgmr.msra.gmra.mrb[0].mxu0 %vm408_vm0, %v380_v18  ;;  %1048 = vmatmul.mubr.msk.f32.vlgmr.msra.gmra.mrb[0].mxu1 %vm408_vm0, %v380_v18 }
  0xa7   : > { %491 = vmatprep.mubr.f32.mxu0 %v1279_v15  ;;  %580 = vmatprep.mubr.f32.mxu1 %v1279_v15 }
  0xaa   : > { %1045 = vmatmul.mubr.msk.f32.gmra.mrb[2].mxu0 %vm408_vm0, %v381_v19  ;;  %1049 = vmatmul.mubr.msk.f32.gmra.mrb[2].mxu1 %vm408_vm0, %v381_v19 }
  0xab   : > { %497 = vmatprep.mubr.f32.mxu0 %v1279_v15  ;;  %586 = vmatprep.mubr.f32.mxu1 %v1279_v15 }
  0xae   : > { %1046 = vmatmul.mubr.msk.f32.gmra.mrb[4].mxu0 %vm408_vm0, %v382_v20  ;;  %1050 = vmatmul.mubr.msk.f32.gmra.mrb[4].mxu1 %vm408_vm0, %v382_v20 }
  0xaf   : > { %503 = vmatprep.mubr.f32.mxu0 %v1279_v15  ;;  %592 = vmatprep.mubr.f32.mxu1 %v1279_v15 }
  0xb2   : > { %1047 = vmatmul.mubr.msk.f32.gmra.mrb[6].mxu0 %vm408_vm0, %v383_v21  ;;  %1051 = vmatmul.mubr.msk.f32.gmra.mrb[6].mxu1 %vm408_vm0, %v383_v21  ;;  %v1052_v21 = vld [vmem:[%s1552_s3 + $0x20] sm:$0xff] }
  0xb3   : > { %721 = vmatprep.mubr.f32.mxu0 %v1279_v15  ;;  %810 = vmatprep.mubr.f32.mxu1 %v1279_v15 }
 0x179   : > { %v487_v25 = vpop.f32.mrb[0].mxu0  ;;  %v576_v27 = vpop.f32.mrb[0].mxu1 }
 0x17a   : > { %v488_v26 = vadd.f32 %v487_v25, %v391_v24  ;;  %v489_v28 = vpop.f32.mrb[1].mxu0  ;;  %v577_v29 = vadd.f32 %v576_v27, %v391_v24  ;;  %v578_v31 = vpop.f32.mrb[1].mxu1  ;;  %v1054_v25 = vld [vmem:[%s1552_s3 + $0x30] sm:$0xff] }
 0x17b   : > { %v490_v30 = vadd.f32 %v489_v28, %v391_v24  ;;  %v579_v32 = vadd.f32 %v578_v31, %v391_v24  ;;  %v1053_v24 = vld [vmem:[%s1552_s3 + $0x28] sm:$0xff]  ;;  %v628_v27 = vpop.permute.xlu0 %627 }
 0x17c   : > { %1150 = vtanh.f32 %v488_v26  ;;  %v1055_v26 = vld [vmem:[%s1552_s3 + $0x38] sm:$0xff] }
 0x17d   : > { %1152 = vtanh.f32 %v577_v29  ;;  %v493_v34 = vpop.f32.mrb[2].mxu0  ;;  %v582_v36 = vpop.f32.mrb[2].mxu1 }
 0x17e   : > { %1154 = vtanh.f32 %v490_v30  ;;  %v494_v35 = vadd.f32 %v493_v34, %v396_v33  ;;  %v495_v37 = vpop.f32.mrb[3].mxu0  ;;  %v583_v38 = vadd.f32 %v582_v36, %v396_v33  ;;  %v584_v40 = vpop.f32.mrb[3].mxu1 }
 0x17f   : > { %1156 = vtanh.f32 %v579_v32  ;;  %v496_v39 = vadd.f32 %v495_v37, %v396_v33  ;;  %v585_v41 = vadd.f32 %v584_v40, %v396_v33  ;;  %v633_v36 = vpop.permute.xlu1 %632 }
 0x180   : > { %1158 = vtanh.f32 %v494_v35 }
 0x181   : > { %1160 = vtanh.f32 %v583_v38  ;;  %v499_v43 = vpop.f32.mrb[4].mxu0  ;;  %v588_v45 = vpop.f32.mrb[4].mxu1 }
 0x182   : > { %1162 = vtanh.f32 %v496_v39  ;;  %v500_v44 = vadd.f32 %v499_v43, %v401_v42  ;;  %v501_v46 = vpop.f32.mrb[5].mxu0  ;;  %v589_v47 = vadd.f32 %v588_v45, %v401_v42  ;;  %v590_v49 = vpop.f32.mrb[5].mxu1 }
 0x183   : > { %1164 = vtanh.f32 %v585_v41  ;;  %v502_v48 = vadd.f32 %v501_v46, %v401_v42  ;;  %v591_v50 = vadd.f32 %v590_v49, %v401_v42 }
 0x184   : > { %1166 = vtanh.f32 %v500_v44  ;;  %v638_v44 = vpop.permute.xlu0 %637 }
 0x185   : > { %1168 = vtanh.f32 %v589_v47  ;;  %v505_v52 = vpop.f32.mrb[6].mxu0  ;;  %v594_v55 = vpop.f32.mrb[6].mxu1 }
 0x186   : > { %v1151_v53 = vpop.eup %1150  ;;  %1170 = vtanh.f32 %v502_v48  ;;  %v506_v54 = vadd.f32 %v505_v52, %v406_v51  ;;  %v507_v56 = vpop.f32.mrb[7].mxu0  ;;  %v595_v58 = vadd.f32 %v594_v55, %v406_v51 }
 0x187   : > { %v1153_v57 = vpop.eup %1152  ;;  %1172 = vtanh.f32 %v591_v50  ;;  %v508_v59 = vadd.f32 %v507_v56, %v406_v51  ;;  %v596_v60 = vpop.f32.mrb[7].mxu1 }
 0x188   : > { %v1155_v61 = vpop.eup %1154  ;;  %1174 = vtanh.f32 %v506_v54  ;;  %v597_v62 = vadd.f32 %v596_v60, %v406_v51  ;;  %v643_v52 = vpop.permute.xlu1 %642 }
 0x189   : > { %v1157_v63 = vpop.eup %1156  ;;  %1176 = vtanh.f32 %v595_v58 }
 0x18a   : > { %v1159_v0 = vpop.eup %1158  ;;  %1178 = vtanh.f32 %v508_v59 }
 0x18b   : > { %v1161_v1 = vpop.eup %1160  ;;  %1180 = vtanh.f32 %v597_v62  ;;  %v1092_v2 = vpack.c.bf16 %v1159_v0, %v1151_v53  ;;  %v858_v0 = vpop.permute.xlu0 %857 }
 0x18c   : > { %v1163_v3 = vpop.eup %1162  ;;  %v1100_v4 = vpack.c.bf16 %v1161_v1, %v1153_v57 }
 0x18d   : > { %v1165_v5 = vpop.eup %1164  ;;  %v1090_v6 = vpack.c.bf16 %v1163_v3, %v1155_v61 }
 0x18e   : > { %v1167_v7 = vpop.eup %1166  ;;  %v1098_v8 = vpack.c.bf16 %v1165_v5, %v1157_v63 }
 0x18f   : > { %v1169_v9 = vpop.eup %1168  ;;  %1091 = vmatprep.subr.bf16.mxu0 %v1090_v6 }
 0x190   : > { %v1171_v10 = vpop.eup %1170  ;;  %1099 = vmatprep.subr.bf16.mxu1 %v1098_v8  ;;  %1093 = vmatpush1.bf16.msra.mxu0 %v1092_v2 }
 0x191   : > { %v1173_v11 = vpop.eup %1172  ;;  %1101 = vmatpush1.bf16.msra.mxu1 %v1100_v4  ;;  %v863_v4 = vpop.permute.xlu1 %862 }
 0x192   : > { %v1175_v12 = vpop.eup %1174 }
 0x193   : > { %v1177_v13 = vpop.eup %1176  ;;  %v1096_v14 = vpack.c.bf16 %v1175_v12, %v1167_v7 }
 0x194   : > { %v1179_v16 = vpop.eup %1178  ;;  %v1104_v17 = vpack.c.bf16 %v1177_v13, %v1169_v9 }
 0x195   : > { %v1181_v18 = vpop.eup %1180  ;;  %v1094_v19 = vpack.c.bf16 %v1179_v16, %v1171_v10 }
 0x196   : > { %v1102_v20 = vpack.c.bf16 %v1181_v18, %v1173_v11 }
 0x197   : > { %1095 = vmatprep.subr.bf16.mxu0 %v1094_v19 }
 0x198   : > { %1103 = vmatprep.subr.bf16.mxu1 %v1102_v20  ;;  %1097 = vmatpush1.bf16.msra.mxu0 %v1096_v14 }
 0x199   : > { %1105 = vmatpush1.bf16.msra.mxu1 %v1104_v17  ;;  %v868_v17 = vpop.permute.xlu0 %867 }
 0x19b   : > { %1060 = vmatmul.mubr.msk.f32.vlgmr.msra.gmra.mrb[8].mxu0 %vm408_vm0, %v1052_v21 }
 0x19c   : > { %1064 = vmatmul.mubr.msk.f32.vlgmr.msra.gmra.mrb[8].mxu1 %vm408_vm0, %v1052_v21  ;;  %727 = vmatprep.mubr.f32.mxu0 %v1279_v15 }
 0x19d   : > { %816 = vmatprep.mubr.f32.mxu1 %v1279_v15 }
 0x19f   : > { %1061 = vmatmul.mubr.msk.f32.gmra.mrb[10].mxu0 %vm408_vm0, %v1053_v24 }
 0x1a0   : > { %1065 = vmatmul.mubr.msk.f32.gmra.mrb[10].mxu1 %vm408_vm0, %v1053_v24  ;;  %733 = vmatprep.mubr.f32.mxu0 %v1279_v15 }
 0x1a1   : > { %822 = vmatprep.mubr.f32.mxu1 %v1279_v15 }
 0x1a3   : > { %1062 = vmatmul.mubr.msk.f32.gmra.mrb[12].mxu0 %vm408_vm0, %v1054_v25 }
 0x1a4   : > { %1066 = vmatmul.mubr.msk.f32.gmra.mrb[12].mxu1 %vm408_vm0, %v1054_v25  ;;  %739 = vmatprep.mubr.f32.mxu0 %v1279_v15 }
 0x1a5   : > { %828 = vmatprep.mubr.f32.mxu1 %v1279_v15 }
 0x1a7   : > { %1063 = vmatmul.mubr.msk.f32.gmra.mrb[14].mxu0 %vm408_vm0, %v1055_v26 }
 0x1a8   : > { %1067 = vmatmul.mubr.msk.f32.gmra.mrb[14].mxu1 %vm408_vm0, %v1055_v26 }
 0x26e   : > { %v723_v28 = vpop.f32.mrb[8].mxu0 }
 0x26f   : > { %v724_v29 = vadd.f32 %v723_v28, %v628_v27  ;;  %v812_v30 = vpop.f32.mrb[8].mxu1  ;;  %v725_v31 = vpop.f32.mrb[9].mxu0 }
 0x270   : > { %v813_v32 = vadd.f32 %v812_v30, %v628_v27  ;;  %v726_v33 = vadd.f32 %v725_v31, %v628_v27  ;;  %v814_v34 = vpop.f32.mrb[9].mxu1 }
 0x271   : > { %1182 = vtanh.f32 %v724_v29  ;;  %v815_v35 = vadd.f32 %v814_v34, %v628_v27 }
 0x272   : > { %1184 = vtanh.f32 %v813_v32  ;;  %v729_v37 = vpop.f32.mrb[10].mxu0 }
 0x273   : > { %1186 = vtanh.f32 %v726_v33  ;;  %v730_v38 = vadd.f32 %v729_v37, %v633_v36  ;;  %v818_v15 = vpop.f32.mrb[10].mxu1  ;;  %v731_v39 = vpop.f32.mrb[11].mxu0 }
 0x274   : > { %1188 = vtanh.f32 %v815_v35  ;;  %v819_v40 = vadd.f32 %v818_v15, %v633_v36  ;;  %v732_v41 = vadd.f32 %v731_v39, %v633_v36  ;;  %v820_v42 = vpop.f32.mrb[11].mxu1  ;;  %v873_v33 = vpop.permute.xlu1 %872 }
 0x275   : > { %1190 = vtanh.f32 %v730_v38  ;;  %v821_v43 = vadd.f32 %v820_v42, %v633_v36 }
 0x276   : > { %1192 = vtanh.f32 %v819_v40  ;;  %v735_v45 = vpop.f32.mrb[12].mxu0 }
 0x277   : > { %1194 = vtanh.f32 %v732_v41  ;;  %v736_v46 = vadd.f32 %v735_v45, %v638_v44  ;;  %v824_v47 = vpop.f32.mrb[12].mxu1  ;;  %v737_v48 = vpop.f32.mrb[13].mxu0 }
 0x278   : > { %1196 = vtanh.f32 %v821_v43  ;;  %v825_v49 = vadd.f32 %v824_v47, %v638_v44  ;;  %v738_v50 = vadd.f32 %v737_v48, %v638_v44  ;;  %v826_v51 = vpop.f32.mrb[13].mxu1 }
 0x279   : > { %1198 = vtanh.f32 %v736_v46  ;;  %v827_v53 = vadd.f32 %v826_v51, %v638_v44 }
 0x27a   : > { %1200 = vtanh.f32 %v825_v49  ;;  %v741_v54 = vpop.f32.mrb[14].mxu0 }
 0x27b   : > { %v1183_v55 = vpop.eup %1182  ;;  %1202 = vtanh.f32 %v738_v50  ;;  %v742_v56 = vadd.f32 %v741_v54, %v643_v52  ;;  %v830_v57 = vpop.f32.mrb[14].mxu1 }
 0x27c   : > { %v743_v58 = vpop.f32.mrb[15].mxu0  ;;  %v1185_v59 = vpop.eup %1184  ;;  %1204 = vtanh.f32 %v827_v53  ;;  %v831_v60 = vadd.f32 %v830_v57, %v643_v52  ;;  %v875_v6 = vmul.f32 %v1183_v55, %v858_v0 }
 0x27d   : > { %v744_v61 = vadd.f32 %v743_v58, %v643_v52  ;;  %v832_v62 = vpop.f32.mrb[15].mxu1  ;;  %v1187_v63 = vpop.eup %1186  ;;  %1206 = vtanh.f32 %v742_v56  ;;  %v877_v9 = vmul.f32 %v1185_v59, %v858_v0 }
 0x27e   : > { %v833_v1 = vadd.f32 %v832_v62, %v643_v52  ;;  %v1189_v2 = vpop.eup %1188  ;;  %1208 = vtanh.f32 %v831_v60  ;;  %v876_v12 = vmul.f32 %v1187_v63, %v858_v0  ;;  %v1280_v60 = vmov 1966171168  }
 0x27f   : > { %v1191_v3 = vpop.eup %1190  ;;  %1210 = vtanh.f32 %v744_v61  ;;  %v878_v18 = vmul.f32 %v1189_v2, %v858_v0  ;;  %v940_v61 = vunpack.c.l.s4 %v1280_v60 }
 0x280   : > { %v1193_v5 = vpop.eup %1192  ;;  %v879_v7 = vmul.f32 %v1191_v3, %v863_v4  ;;  %1212 = vtanh.f32 %v833_v1 }
 0x281   : > { %v1195_v8 = vpop.eup %1194  ;;  %v881_v10 = vmul.f32 %v1193_v5, %v863_v4 }
 0x282   : > { %v1197_v11 = vpop.eup %1196  ;;  %v891_v13 = vadd.f32 %v879_v7, %v875_v6  ;;  %v880_v14 = vmul.f32 %v1195_v8, %v863_v4  ;;  %v941_v7 = vunpack.c.0.s8 %v940_v61 }
 0x283   : > { %v1199_v16 = vpop.eup %1198  ;;  %v909_v19 = vadd.f32 %v881_v10, %v877_v9  ;;  %v882_v20 = vmul.f32 %v1197_v11, %v863_v4  ;;  %v928_v4 = vstv %s927_s14 }
 0x284   : > { %v1201_v21 = vpop.eup %1200  ;;  %v900_v24 = vadd.f32 %v880_v14, %v876_v12  ;;  %v883_v25 = vmul.f32 %v1199_v16, %v868_v17  ;;  %v944_v16 = vsub.s32 %v941_v7, %v1437_v23 }
 0x285   : > { %v1203_v26 = vpop.eup %1202  ;;  %v918_v27 = vadd.f32 %v882_v20, %v878_v18  ;;  %v885_v28 = vmul.f32 %v1201_v21, %v868_v17 }
 0x286   : > { %v1205_v29 = vpop.eup %1204  ;;  %v892_v30 = vadd.f32 %v891_v13, %v883_v25  ;;  %v884_v31 = vmul.f32 %v1203_v26, %v868_v17 }
 0x287   : > { %v1207_v32 = vpop.eup %1206  ;;  %v910_v34 = vadd.f32 %v909_v19, %v885_v28  ;;  %v886_v35 = vmul.f32 %v1205_v29, %v868_v17 }
 0x288   : > { %v1209_v36 = vpop.eup %1208  ;;  %v901_v37 = vadd.f32 %v900_v24, %v884_v31  ;;  %v887_v38 = vmul.f32 %v1207_v32, %v873_v33 }
 0x289   : > { %v1211_v15 = vpop.eup %1210  ;;  %v919_v39 = vadd.f32 %v918_v27, %v886_v35  ;;  %v889_v40 = vmul.f32 %v1209_v36, %v873_v33 }
 0x28a   : > { %v1213_v41 = vpop.eup %1212  ;;  %v893_v42 = vadd.f32 %v892_v30, %v887_v38  ;;  %v888_v43 = vmul.f32 %v1211_v15, %v873_v33 }
 0x28b   : > { %v911_v44 = vadd.f32 %v910_v34, %v889_v40  ;;  %v890_v45 = vmul.f32 %v1213_v41, %v873_v33 }
 0x28c   : > { %v894_v46 = vrot.slane %v893_v42, 4  ;;  %v902_v47 = vadd.f32 %v901_v37, %v888_v43 }
 0x28d   : > { %v912_v48 = vrot.slane %v911_v44, 4  ;;  %v920_v49 = vadd.f32 %v919_v39, %v890_v45 }
 0x28e   : > { %v895_v50 = vadd.f32 %v894_v46, %v893_v42  ;;  %v903_v51 = vrot.slane %v902_v47, 4 }
 0x28f   : > { %v913_v52 = vadd.f32 %v912_v48, %v911_v44  ;;  %v921_v53 = vrot.slane %v920_v49, 4 }
 0x290   : > { %v896_v54 = vrot.slane %v895_v50, 2  ;;  %v904_v55 = vadd.f32 %v903_v51, %v902_v47 }
 0x291   : > { %v914_v56 = vrot.slane %v913_v52, 2  ;;  %v922_v57 = vadd.f32 %v921_v53, %v920_v49 }
 0x292   : > { %v897_v58 = vadd.f32 %v896_v54, %v895_v50  ;;  %v905_v59 = vrot.slane %v904_v55, 2 }
 0x293   : > { %v915_v62 = vadd.f32 %v914_v56, %v913_v52  ;;  %v923_v63 = vrot.slane %v922_v57, 2 }
 0x294   : > { %v906_v0 = vadd.f32 %v905_v59, %v904_v55  ;;  %v898_v1 = vrot.slane %v897_v58, 1 }
 0x295   : > { %v924_v2 = vadd.f32 %v923_v63, %v922_v57  ;;  %v916_v3 = vrot.slane %v915_v62, 1 }
 0x296   : > { %v899_v5 = vadd.f32 %v898_v1, %v897_v58  ;;  %v907_v6 = vrot.slane %v906_v0, 1 }
 0x297   : > { %v917_v8 = vadd.f32 %v916_v3, %v915_v62  ;;  %v925_v9 = vrot.slane %v924_v2, 1 }
 0x298   : > { %v908_v10 = vadd.f32 %v907_v6, %v906_v0  ;;  %v929_v11 = vadd.f32 %v928_v4, %v899_v5 }
 0x299   : > { %v926_v12 = vadd.f32 %v925_v9, %v924_v2  ;;  %v931_v13 = vadd.f32 %v928_v4, %v917_v8 }
 0x29a   : > { %v930_v14 = vadd.f32 %v928_v4, %v908_v10 }
 0x29b   : > { %v932_v17 = vadd.f32 %v928_v4, %v926_v12 }
 0x29c   : > { %v937_v18 = vcombine.low %v929_v11, %v930_v14 }
 0x29d   : > { %v938_v19 = vcombine.low %v931_v13, %v932_v17 }
 0x29e   : > { %v945_v20 = vrot.slane %v937_v18, %v944_v16 }
 0x29f   : > { %v952_v21 = vrot.slane %v938_v19, %v944_v16 }
 0x2a1   : > { %v953_v24 = vcombine.low %v945_v20, %v952_v21 }
 0x2a3   : > { %v960_v25 = vrot.slane %v953_v24, %v944_v16 }
 0x2a5   : > { %966 = vst.msk [vmem:[%s271_s18] sm:$0xf] %vm964_vm1, %v960_v25 }
 0x2a6   : > { %1227 = shalt.err (!%p1224_p3)
}
 0x2a7   : > { %s1228_s9 = scalar_lea.hbm %s1507_s22, 64  ;;  %s1232_s15 = scalar_lea.hbm %s1556_s7, 128 }
 0x2a8   : > { %p1229_p4 = scmp.ne.s32.totalorder %s1507_s22, %s1228_s9  ;;  %p1233_p9 = scmp.lt.u32.totalorder %s1507_s22, %s1556_s7 }
 0x2a9   : > { %p1234_p10 = scmp.lt.u32.totalorder %s1232_s15, %s1228_s9  ;;  %p1236_p12 = scmp.lt.u32.totalorder %s1228_s9, %s1507_s22 }
 0x2aa   : > { %p1230_p7 = pnand %p1229_p4, %p1363_p5 }
 0x2ab   : > { %p1235_p11 = por %p1234_p10, %p1233_p9 }
 0x2ac   : > { %p1231_p8 = pneg %p1230_p7 }
 0x2ad   : > { %p1237_p13 = por %p1236_p12, %p1235_p11 }
 0x2af   : > { %p1238_p0 = pnand %p1237_p13, %p1231_p8 }
 0x2b1   : > { %1241 = shalt.err (!%p1238_p0)
}
 0x2b2   : > { %1106 = dma.vmem_to_hbm [thread:$0]  (%p1363_p5), %s1509_s19, 64, %s1507_s22, %s968_s23  }
 0x2b3 PF: > { %p1112_p1 = scmp.ge.s32.totalorder %s1276_s29, 2  ;;  %s994_s18 = sand.u32 1, %s1264_s26  }
 0x2b4   : > { %s995_s20 = scalar_lea.sflag [#allocation4], %s994_s18 }
 0x2b5   : > { %p1109_p2 = pnand %p1112_p1, %p1367_p6 }
 0x2b7   : > { %1259 = dma.done.wait (!%p1109_p2), %s995_s20, 64  }
 0x2b8   : > { %1261 = vsyncadd (!%p1109_p2), %s995_s20, 4294967232  ;;  %p18_p3 = scmp.ge.s32.totalorder %s1350_s8, 4   ;;  %s1559_s26 = smov %s1268_s27 }
 0x2b9   : > { %s1560_s27 = smov %s1272_s28  ;;  %s1561_s28 = smov %s1361_s11 }
 0x2ba   : > { %s1562_s29 = smov %s1350_s8  ;;  %20 = sbr.rel (!%p18_p3) target bundleno = 5 (0x5), region = 85 }
 0x2c1   :  { %1000 = vsyncpa [#allocation4], 1 }
 0x2c2   :  { %1002 = vsyncpa [#allocation4 + $0x1], 1 }

</bundles_post_ra>
